<compile_context>
chip_gen: v7x
topology: tpu7x:2x2x1
jax: 0.10.0
libtpu: 0.0.40
codegen_flags: <defaults>
</compile_context>

<pallas_src>
import jax
import jax.numpy as jnp
from jax.experimental import pallas as pl
from jax.experimental.pallas import tpu as pltpu

H1, H2, H3 = 256, 128, 64          # hidden widths fixed by the module


def _mlp_fused_kernel(x_ref, w1_ref, w234_ref, epi_ref, o_ref, acc_ref):
    """One K-tile of layer 1 per grid step; layers 2..4 on the last step.

    x_ref    : [B, tk]  f32   (cast to bf16 in-kernel)
    w1_ref   : [tk, 256] int8 (per-output-channel quantized)
    w234_ref : [448, 128] bf16 slab  (W2 rows 0:256, W3 rows 256:384 cols 0:64,
                                      W4 rows 384:448 cols 0:A)
    epi_ref  : [5, 256] f32 slab     (row0=scale1, row1=b1, row2=b2, row3=b3, row4=b4)
    o_ref    : [B, A] f32
    acc_ref  : [B, 256] f32 VMEM scratch (layer-1 accumulator)
    """
    k = pl.program_id(0)

    @pl.when(k == 0)
    def _init():
        acc_ref[...] = jnp.zeros_like(acc_ref)

    # ---- layer-1 partial product for this K tile (bf16 MXU, f32 accumulate) ----
    x_bf = x_ref[...].astype(jnp.bfloat16)                       # VPU cast, free under DMA
    w1_bf = w1_ref[...].astype(jnp.float32).astype(jnp.bfloat16)  # exact widen of int8
    acc_ref[...] += jnp.dot(x_bf, w1_bf, preferred_element_type=jnp.float32)

    # ---- epilogue: dequant + bias + ReLU, then the tiny layers 2..4 ----
    @pl.when(k == pl.num_programs(0) - 1)
    def _tail():
        num_actions = o_ref.shape[1]

        scale1 = epi_ref[0:1, :]                                  # [1,256]
        b1 = epi_ref[1:2, :]
        h = jnp.maximum(acc_ref[...] * scale1 + b1, 0.0)          # [B,256] f32

        w2 = w234_ref[0:H1, :]                                    # [256,128] bf16
        b2 = epi_ref[2:3, 0:H2]
        h = jnp.dot(h.astype(jnp.bfloat16), w2, preferred_element_type=jnp.float32)
        h = jnp.maximum(h + b2, 0.0)                              # [B,128]

        w3 = w234_ref[H1:H1 + H2, 0:H3]                           # [128,64]
        b3 = epi_ref[3:4, 0:H3]
        h = jnp.dot(h.astype(jnp.bfloat16), w3, preferred_element_type=jnp.float32)
        h = jnp.maximum(h + b3, 0.0)                              # [B,64]

        w4 = w234_ref[H1 + H2:H1 + H2 + H3, 0:num_actions]        # [64,A]
        b4 = epi_ref[4:5, 0:num_actions]
        h = jnp.dot(h.astype(jnp.bfloat16), w4, preferred_element_type=jnp.float32)
        o_ref[...] = (h + b4).astype(o_ref.dtype)                 # final layer: no ReLU


def _choose_block_k(K, max_block_k):
    """Largest multiple of 128 dividing K that is <= max_block_k (else full K)."""
    if K <= max_block_k or K % 128 != 0:
        return K
    tk = 128
    for cand in range(128, max_block_k + 1, 128):
        if K % cand == 0:
            tk = cand
    return tk


def mlp_forward(x, packed, num_actions, *, max_block_k=1920):
    """Fused relu(fc1)->relu(fc2)->relu(fc3)->fc4 in a single pallas_call.

    x: [B, in_features] f32 (cast to bf16 inside the kernel).
    packed: (w1_q int8 [K,256], w234 bf16 [448,128], epi f32 [5,256]) from prepare_params.
    num_actions: static output width.
    """
    w1_q, w234, epi = packed
    B, K = x.shape
    tk = _choose_block_k(K, max_block_k)
    nk = K // tk

    return pl.pallas_call(
        _mlp_fused_kernel,
        out_shape=jax.ShapeDtypeStruct((B, num_actions), jnp.float32),
        grid_spec=pltpu.PrefetchScalarGridSpec(
            num_scalar_prefetch=0,
            grid=(nk,),
            in_specs=[
                pl.BlockSpec((B, tk), lambda k: (0, k)),        # x   (f32)
                pl.BlockSpec((tk, H1), lambda k: (k, 0)),       # W1  (int8), double-buffered
                pl.BlockSpec(w234.shape, lambda k: (0, 0)),     # W2/W3/W4 slab (fetched once)
                pl.BlockSpec(epi.shape, lambda k: (0, 0)),      # scales + biases (fetched once)
            ],
            out_specs=pl.BlockSpec((B, num_actions), lambda k: (0, 0)),
            scratch_shapes=[pltpu.VMEM((B, H1), jnp.float32)],
        ),
        # Peak VMEM after K-tiling is ~1-2 MiB, well under every generation's
        # default scoped limit -> no vmem_limit_bytes override needed.
        compiler_params=pltpu.CompilerParams(
            dimension_semantics=("arbitrary",),   # K is a reduction axis
        ),
    )(x, w1_q, w234, epi)


def init_mlp_params(key, in_features, num_actions):
    """Deterministic synthetic parameters in PyTorch Linear layout: W [out,in], b [out]."""
    dims = [in_features, H1, H2, H3, num_actions]
    params = []
    for i in range(4):
        key, kw, kb = jax.random.split(key, 3)
        bound = 1.0 / (dims[i] ** 0.5)
        w = jax.random.uniform(kw, (dims[i + 1], dims[i]), jnp.float32, -bound, bound)
        b = jax.random.uniform(kb, (dims[i + 1],), jnp.float32, -bound, bound)
        params.append((w, b))
    return params


def prepare_params(params):
    """One-time packing: int8 W1 + per-channel scales, bf16 W2..W4 slab, f32 bias slab."""
    (w1, b1), (w2, b2), (w3, b3), (w4, b4) = params
    num_actions = w4.shape[0]
    assert num_actions <= H2, "slab layout assumes num_actions <= 128"

    # W1: PyTorch [256, K] -> [K, 256], symmetric per-output-channel int8.
    w1_t = jnp.asarray(w1, jnp.float32).T                         # [K, 256]
    absmax = jnp.max(jnp.abs(w1_t), axis=0)                       # [256]
    scale1 = jnp.where(absmax > 0, absmax / 127.0, 1.0)
    w1_q = jnp.clip(jnp.round(w1_t / scale1), -127.0, 127.0).astype(jnp.int8)

    # W2/W3/W4: one padded bf16 slab [448, 128] (weights stored [in, out]).
    w234 = jnp.zeros((H1 + H2 + H3, H2), jnp.bfloat16)
    w234 = w234.at[0:H1, 0:H2].set(w2.T.astype(jnp.bfloat16))
    w234 = w234.at[H1:H1 + H2, 0:H3].set(w3.T.astype(jnp.bfloat16))
    w234 = w234.at[H1 + H2:H1 + H2 + H3, 0:num_actions].set(w4.T.astype(jnp.bfloat16))

    # W1 dequant scales + all biases: one f32 slab [5, 256].
    epi = jnp.zeros((5, H1), jnp.float32)
    epi = epi.at[0, :].set(scale1)
    epi = epi.at[1, :].set(b1.astype(jnp.float32))
    epi = epi.at[2, 0:H2].set(b2.astype(jnp.float32))
    epi = epi.at[3, 0:H3].set(b3.astype(jnp.float32))
    epi = epi.at[4, 0:num_actions].set(b4.astype(jnp.float32))

    return (w1_q, w234, epi)


if __name__ == "__main__":
    key = jax.random.PRNGKey(0)
    k_x, k_p = jax.random.split(key)

    # Small shapes consistent with the module's forward: x is [batch, in_features].
    batch = 2
    in_features = 384      # small stand-in for the default 80*80*3 = 19200
    num_actions = 3

    x = jax.random.normal(k_x, (batch, in_features), jnp.float32)
    params = init_mlp_params(k_p, in_features, num_actions)   # PyTorch layout (reference)
    packed = prepare_params(params)                           # kernel layout (packed once)

    fwd = jax.jit(mlp_forward, static_argnames=("num_actions", "max_block_k"))
    # max_block_k=128 forces a 3-step K grid here to exercise the accumulator
    # path; production (19200 features) uses the default 1920 -> 10 K-steps.
    out = jax.block_until_ready(
        fwd(x, packed, num_actions=num_actions, max_block_k=128))
    assert out.shape == (batch, num_actions)

    # Matched-precision reference mirroring the kernel's numerics exactly
    # (int8 W1 + per-channel scale, bf16 matmul inputs, f32 accumulate/bias/ReLU).
    w1_q, _, epi = packed
    (_, b1), (w2r, b2), (w3r, b3), (w4r, b4) = params
    ref = jnp.dot(x.astype(jnp.bfloat16).astype(jnp.float32),
                  w1_q.astype(jnp.float32)) * epi[0][None, :] + b1[None, :]
    ref = jnp.maximum(ref, 0.0)
    for w, b, relu in ((w2r, b2, True), (w3r, b3, True), (w4r, b4, False)):
        lhs = ref.astype(jnp.bfloat16).astype(jnp.float32)
        rhs = w.T.astype(jnp.bfloat16).astype(jnp.float32)
        ref = lhs @ rhs + b[None, :]
        if relu:
            ref = jnp.maximum(ref, 0.0)
    assert jnp.allclose(out, ref, atol=2e-3, rtol=2e-3), \
        float(jnp.max(jnp.abs(out - ref)))

    # Loose sanity check against full-f32 math with the original (unquantized)
    # weights: int8 W1 + bf16 MXU inputs => ~1% class error on Q-values.
    ref32 = x
    for i, (w, b) in enumerate(params):
        ref32 = ref32 @ w.T + b
        if i < 3:
            ref32 = jnp.maximum(ref32, 0.0)
    assert jnp.allclose(out, ref32, atol=1e-1, rtol=1e-1), \
        float(jnp.max(jnp.abs(out - ref32)))

    print("KERNEL_OK")
</pallas_src>

<mosaic_0001>
module attributes {stable_mosaic.version = 11 : i64} {
  func.func @_mlp_fused_kernel(%arg0: i32, %arg1: memref<2x128xf32, #tpu.memory_space<vmem>>, %arg2: memref<128x256xi8, #tpu.memory_space<vmem>>, %arg3: memref<448x128xbf16, #tpu.memory_space<vmem>>, %arg4: memref<5x256xf32, #tpu.memory_space<vmem>>, %arg5: memref<2x3xf32, #tpu.memory_space<vmem>>, %arg6: memref<2x256xf32, #tpu.memory_space<vmem>>) attributes {dimension_semantics = [#tpu.dimension_semantics<arbitrary>], iteration_bounds = array<i64: 3>, scalar_prefetch = 0 : i64, scratch_operands = 1 : i64, tpu.core_type = #tpu.core_type<tc>, window_params = [{transform_indices = @transform_0, window_bounds = array<i64: 2, 128>}, {transform_indices = @transform_1, window_bounds = array<i64: 128, 256>}, {pipeline_mode = #tpu.pipeline_mode<synchronous>, transform_indices = @transform_2, window_bounds = array<i64: 448, 128>}, {pipeline_mode = #tpu.pipeline_mode<synchronous>, transform_indices = @transform_3, window_bounds = array<i64: 5, 256>}, {pipeline_mode = #tpu.pipeline_mode<synchronous>, transform_indices = @transform_4, window_bounds = array<i64: 2, 3>}]} {
    %c0_i32 = arith.constant 0 : i32
    %0 = arith.cmpi eq, %arg0, %c0_i32 : i32
    %1 = arith.extui %0 : i1 to i32
    %c0_i32_0 = arith.constant 0 : i32
    %2 = arith.cmpi ne, %1, %c0_i32_0 : i32
    scf.if %2 {
      %cst_9 = arith.constant 0.000000e+00 : f32
      %15 = vector.broadcast %cst_9 : f32 to vector<2x256xf32>
      %c0_10 = arith.constant 0 : index
      %c0_11 = arith.constant 0 : index
      %16 = vector.load %arg6[%c0_10, %c0_11] : memref<2x256xf32, #tpu.memory_space<vmem>>, vector<2x256xf32>
      tpu.vector_store %arg6[%c0_10, %c0_11], %15 {strides = array<i32>} : memref<2x256xf32, #tpu.memory_space<vmem>>, vector<2x256xf32>,
    } else {
    }
    %c0 = arith.constant 0 : index
    %c0_1 = arith.constant 0 : index
    %3 = vector.load %arg1[%c0, %c0_1] : memref<2x128xf32, #tpu.memory_space<vmem>>, vector<2x128xf32>
    %4 = arith.truncf %3 : vector<2x128xf32> to vector<2x128xbf16>
    %c0_2 = arith.constant 0 : index
    %c0_3 = arith.constant 0 : index
    %5 = vector.load %arg2[%c0_2, %c0_3] : memref<128x256xi8, #tpu.memory_space<vmem>>, vector<128x256xi8>
    %6 = arith.sitofp %5 : vector<128x256xi8> to vector<128x256xf32>
    %7 = arith.truncf %6 : vector<128x256xf32> to vector<128x256xbf16>
    %c0_4 = arith.constant 0 : index
    %c0_5 = arith.constant 0 : index
    %8 = vector.load %arg6[%c0_4, %c0_5] : memref<2x256xf32, #tpu.memory_space<vmem>>, vector<2x256xf32>
    %cst = arith.constant dense<0.000000e+00> : vector<2x256xf32>
    %9 = tpu.matmul %4, %7, %cst {dimension_numbers = #tpu.dot_dimension_numbers<[1], [0], [0], [1], [0, 0, 1, 1], [], []>} : vector<2x128xbf16>, vector<128x256xbf16>, vector<2x256xf32> -> vector<2x256xf32>
    %10 = arith.addf %8, %9 : vector<2x256xf32>
    %c0_6 = arith.constant 0 : index
    %c0_7 = arith.constant 0 : index
    %11 = vector.load %arg6[%c0_6, %c0_7] : memref<2x256xf32, #tpu.memory_space<vmem>>, vector<2x256xf32>
    tpu.vector_store %arg6[%c0_6, %c0_7], %10 {strides = array<i32>} : memref<2x256xf32, #tpu.memory_space<vmem>>, vector<2x256xf32>,
    %c2_i32 = arith.constant 2 : i32
    %12 = arith.cmpi eq, %arg0, %c2_i32 : i32
    %13 = arith.extui %12 : i1 to i32
    %c0_i32_8 = arith.constant 0 : i32
    %14 = arith.cmpi ne, %13, %c0_i32_8 : i32
    scf.if %14 {
      %c0_9 = arith.constant 0 : index
      %c0_10 = arith.constant 0 : index
      %15 = vector.load %arg4[%c0_9, %c0_10] : memref<5x256xf32, #tpu.memory_space<vmem>>, vector<1x256xf32>
      %c1 = arith.constant 1 : index
      %c0_11 = arith.constant 0 : index
      %16 = vector.load %arg4[%c1, %c0_11] : memref<5x256xf32, #tpu.memory_space<vmem>>, vector<1x256xf32>
      %c0_12 = arith.constant 0 : index
      %c0_13 = arith.constant 0 : index
      %17 = vector.load %arg6[%c0_12, %c0_13] : memref<2x256xf32, #tpu.memory_space<vmem>>, vector<2x256xf32>
      %18 = vector.broadcast %15 : vector<1x256xf32> to vector<2x256xf32>
      %19 = arith.mulf %17, %18 : vector<2x256xf32>
      %20 = vector.broadcast %16 : vector<1x256xf32> to vector<2x256xf32>
      %21 = arith.addf %19, %20 : vector<2x256xf32>
      %cst_14 = arith.constant 0.000000e+00 : f32
      %22 = vector.broadcast %cst_14 : f32 to vector<2x256xf32>
      %23 = arith.maximumf %21, %22 : vector<2x256xf32>
      %c0_15 = arith.constant 0 : index
      %c0_16 = arith.constant 0 : index
      %24 = vector.load %arg3[%c0_15, %c0_16] : memref<448x128xbf16, #tpu.memory_space<vmem>>, vector<256x128xbf16>
      %c2 = arith.constant 2 : index
      %c0_17 = arith.constant 0 : index
      %25 = vector.load %arg4[%c2, %c0_17] : memref<5x256xf32, #tpu.memory_space<vmem>>, vector<1x128xf32>
      %26 = arith.truncf %23 : vector<2x256xf32> to vector<2x256xbf16>
      %cst_18 = arith.constant dense<0.000000e+00> : vector<2x128xf32>
      %27 = tpu.matmul %26, %24, %cst_18 {dimension_numbers = #tpu.dot_dimension_numbers<[1], [0], [0], [1], [0, 0, 1, 1], [], []>} : vector<2x256xbf16>, vector<256x128xbf16>, vector<2x128xf32> -> vector<2x128xf32>
      %28 = vector.broadcast %25 : vector<1x128xf32> to vector<2x128xf32>
      %29 = arith.addf %27, %28 : vector<2x128xf32>
      %cst_19 = arith.constant 0.000000e+00 : f32
      %30 = vector.broadcast %cst_19 : f32 to vector<2x128xf32>
      %31 = arith.maximumf %29, %30 : vector<2x128xf32>
      %c256 = arith.constant 256 : index
      %c0_20 = arith.constant 0 : index
      %32 = vector.load %arg3[%c256, %c0_20] : memref<448x128xbf16, #tpu.memory_space<vmem>>, vector<128x64xbf16>
      %c3 = arith.constant 3 : index
      %c0_21 = arith.constant 0 : index
      %33 = vector.load %arg4[%c3, %c0_21] : memref<5x256xf32, #tpu.memory_space<vmem>>, vector<1x64xf32>
      %34 = arith.truncf %31 : vector<2x128xf32> to vector<2x128xbf16>
      %cst_22 = arith.constant dense<0.000000e+00> : vector<2x64xf32>
      %35 = tpu.matmul %34, %32, %cst_22 {dimension_numbers = #tpu.dot_dimension_numbers<[1], [0], [0], [1], [0, 0, 1, 1], [], []>} : vector<2x128xbf16>, vector<128x64xbf16>, vector<2x64xf32> -> vector<2x64xf32>
      %36 = vector.broadcast %33 : vector<1x64xf32> to vector<2x64xf32>
      %37 = arith.addf %35, %36 : vector<2x64xf32>
      %cst_23 = arith.constant 0.000000e+00 : f32
      %38 = vector.broadcast %cst_23 : f32 to vector<2x64xf32>
      %39 = arith.maximumf %37, %38 : vector<2x64xf32>
      %c384 = arith.constant 384 : index
      %c0_24 = arith.constant 0 : index
      %40 = vector.load %arg3[%c384, %c0_24] : memref<448x128xbf16, #tpu.memory_space<vmem>>, vector<64x3xbf16>
      %c4 = arith.constant 4 : index
      %c0_25 = arith.constant 0 : index
      %41 = vector.load %arg4[%c4, %c0_25] : memref<5x256xf32, #tpu.memory_space<vmem>>, vector<1x3xf32>
      %42 = arith.truncf %39 : vector<2x64xf32> to vector<2x64xbf16>
      %cst_26 = arith.constant dense<0.000000e+00> : vector<2x3xf32>
      %43 = tpu.matmul %42, %40, %cst_26 {dimension_numbers = #tpu.dot_dimension_numbers<[1], [0], [0], [1], [0, 0, 1, 1], [], []>} : vector<2x64xbf16>, vector<64x3xbf16>, vector<2x3xf32> -> vector<2x3xf32>
      %44 = vector.broadcast %41 : vector<1x3xf32> to vector<2x3xf32>
      %45 = arith.addf %43, %44 : vector<2x3xf32>
      %c0_27 = arith.constant 0 : index
      %c0_28 = arith.constant 0 : index
      %46 = vector.load %arg5[%c0_27, %c0_28] : memref<2x3xf32, #tpu.memory_space<vmem>>, vector<2x3xf32>
      tpu.vector_store %arg5[%c0_27, %c0_28], %45 {strides = array<i32>} : memref<2x3xf32, #tpu.memory_space<vmem>>, vector<2x3xf32>,
    } else {
    }
    return
  }
  func.func @transform_0(%arg0: i32) -> (i32, i32) {
    %c0_i32 = arith.constant 0 : i32
    %c0_i32_0 = arith.constant 0 : i32
    return %c0_i32, %arg0 : i32, i32
  }
  func.func @transform_1(%arg0: i32) -> (i32, i32) {
    %c0_i32 = arith.constant 0 : i32
    %c0_i32_0 = arith.constant 0 : i32
    return %arg0, %c0_i32 : i32, i32
  }
  func.func @transform_2(%arg0: i32) -> (i32, i32) {
    %c0_i32 = arith.constant 0 : i32
    %c0_i32_0 = arith.constant 0 : i32
    %c0_i32_1 = arith.constant 0 : i32
    return %c0_i32, %c0_i32_0 : i32, i32
  }
  func.func @transform_3(%arg0: i32) -> (i32, i32) {
    %c0_i32 = arith.constant 0 : i32
    %c0_i32_0 = arith.constant 0 : i32
    %c0_i32_1 = arith.constant 0 : i32
    return %c0_i32, %c0_i32_0 : i32, i32
  }
  func.func @transform_4(%arg0: i32) -> (i32, i32) {
    %c0_i32 = arith.constant 0 : i32
    %c0_i32_0 = arith.constant 0 : i32
    %c0_i32_1 = arith.constant 0 : i32
    return %c0_i32, %c0_i32_0 : i32, i32
  }
}

</mosaic_0001>

<bundles_post_ra>
// kernel: mlp_forward.1
= control target key start
LH: loop header
LB: loop body
LE: loop exit
PB: predicated region body
PF: predicated region fallthrough
CT: control target
= control target key end

     0   :  { %9 = vsyncpa [#allocation4], 0  ;;  %s1614_s0 = inlined_call_operand.hbm [shape: f32[2,384], index: 0, kind: input, shape index: {}]   ;;  %s1615_s1 = inlined_call_operand.hbm [shape: s8[384,256], index: 1, kind: input, shape index: {}]   ;;  %s1616_s2 = inlined_call_operand.hbm [shape: bf16[448,128], index: 2, kind: input, shape index: {}]   ;;  %s1617_s3 = inlined_call_operand.hbm [shape: f32[5,256], index: 3, kind: input, shape index: {}]   ;;  %s1618_s4 = inlined_call_operand.hbm [shape: f32[2,3], index: 4, kind: output, shape index: {}]  }
   0x1   :  { %11 = vsyncpa [#allocation4 + $0x1], 0 }
   0x2   :  { %12 = vsyncpa [#allocation7], 0 }
   0x3   :  { %14 = vsyncpa [#allocation7 + $0x1], 0 }
   0x4   :  { %15 = vsyncpa [#allocation10], 0 }
   0x5   :  { %16 = vsyncpa [#allocation5], 0  ;;  %s1336_s15 = smov 0   ;;  %s1338_s16 = smov 0  }
   0x6   :  { %s1340_s17 = smov 0   ;;  %s1342_s18 = smov 0  }
   0x7 LB: > { %s1355_s19 = sadd.s32 4294967295, %s1295_s18   ;;  %p42_p0 = scmp.ne.s32.totalorder %s1287_s16, %s1283_s15  ;;  %s1295_s18 = sphi %s1342_s18, %s1636_s18   ;;  %s1291_s17 = sphi %s1340_s17, %s1635_s17   ;;  %s1287_s16 = sphi %s1338_s16, %s1634_s16   ;;  %s1283_s15 = sphi %s1336_s15, %s1633_s15  }
   0x8   : > { %p1619_p1 = scmp.eq.s32.totalorder %s1355_s19, 0  ;;  %p874_p2 = scmp.ge.s32.totalorder %s1295_s18, 1 }
   0x9   : > { %p142_p3 = scmp.lt.s32.totalorder %s1295_s18, 4  ;;  %s1297_s22 = smov [#allocation8]  }
   0xa   : > { %p1364_p5 = por %p1619_p1, %p42_p0  ;;  %s154_s23 = sshll.u32 %s1297_s22, 4  ;;  %s155_s23 = int_to_ptr.vmem [resolvable:$true] %s154_s23 }
   0xb   : > { %p1368_p6 = pnand %p874_p2, %p142_p3  ;;  %s1298_s25 = smov [#allocation9]  }
   0xc   : > { %s1622_s20 = scalar_select %p1364_p5, 1, 0 }
   0xd   : > { %s1623_s21 = scalar_select %p1368_p6, 1, 0 }
   0xe   : > { %p1010_p7 = pneg %p1368_p6  ;;  %s168_s26 = sshll.u32 %s1298_s25, 4  ;;  %s1380_s26 = int_to_ptr.vmem [resolvable:$true] %s168_s26 }
   0xf   : > { %s1103_s29 = scalar_lea.hbm %s1616_s2, 3584 }
  0x10   : > { %p1376_p8 = pnand %p1010_p7, %p1619_p1  ;;  %p1104_p9 = scmp.ne.s32.totalorder %s1616_s2, %s1103_s29 }
  0x11   : > { %p1110_p13 = scmp.lt.u32.totalorder %s1103_s29, %s1616_s2 }
  0x12   : > { %p1105_p10 = pneg %p1376_p8 }
  0x14   : > { %p1106_p11 = pnand %p1105_p10, %p1104_p9 }
  0x16   : > { %p1107_p12 = pneg %p1106_p11 }
  0x18   : > { %p1112_p0 = pnand %p1110_p13, %p1107_p12 }
  0x1a   : > { %1115 = shalt.err (!%p1112_p0)
}
  0x1b   : > { %s1116_s8 = scalar_lea.vmem %s155_s23, 3584  ;;  %p1124_p4 = scmp.lt.s32.totalorder %s155_s23, %s155_s23 }
  0x1c   : > { %p1117_p2 = scmp.ne.s32.totalorder %s155_s23, %s1116_s8  ;;  %p1125_p1 = scmp.lt.s32.totalorder %s1116_s8, %s1116_s8 }
  0x1e   : > { %p1119_p3 = pnand %p1117_p2, %p1105_p10  ;;  %p1126_p5 = por %p1125_p1, %p1124_p4 }
  0x20   : > { %p1120_p7 = pneg %p1119_p3 }
  0x22   : > { %p1127_p6 = pnand %p1126_p5, %p1120_p7 }
  0x24   : > { %1130 = shalt.err (!%p1127_p6)
}
  0x25   : > { %s1299_s9 = smov 64   ;;  %s1300_s10 = smov 4  }
  0x26   : > { %1013 = dma.hbm_to_vmem [thread:$0]  (!%p1376_p8), %s1616_s2, 3584, %s155_s23, [#allocation7], %s1299_s9, %s1299_s9, %s1300_s10  }
  0x27   : > { %s1131_s15 = scalar_lea.hbm %s1617_s3, 256 }
  0x28   : > { %p1132_p9 = scmp.ne.s32.totalorder %s1617_s3, %s1131_s15  ;;  %p1138_p5 = scmp.lt.u32.totalorder %s1131_s15, %s1617_s3 }
  0x2a   : > { %p1134_p1 = pnand %p1132_p9, %p1105_p10 }
  0x2c   : > { %p1135_p4 = pneg %p1134_p1 }
  0x2e   : > { %p1140_p6 = pnand %p1138_p5, %p1135_p4 }
  0x30   : > { %1143 = shalt.err (!%p1140_p6)
}
  0x31   : > { %s1144_s23 = scalar_lea.vmem %s1380_s26, 256  ;;  %p1152_p0 = scmp.lt.s32.totalorder %s1380_s26, %s1380_s26 }
  0x32   : > { %p1145_p11 = scmp.ne.s32.totalorder %s1380_s26, %s1144_s23  ;;  %p1153_p2 = scmp.lt.s32.totalorder %s1144_s23, %s1144_s23 }
  0x34   : > { %p1147_p12 = pnand %p1145_p11, %p1105_p10  ;;  %p1154_p3 = por %p1153_p2, %p1152_p0 }
  0x36   : > { %p1148_p13 = pneg %p1147_p12 }
  0x38   : > { %p1155_p7 = pnand %p1154_p3, %p1148_p13 }
  0x3a   : > { %1158 = shalt.err (!%p1155_p7)
}
  0x3b   : > { %1016 = dma.hbm_to_vmem [thread:$0]  (!%p1376_p8), %s1617_s3, 256, %s1380_s26, [#allocation10]  }
  0x3c   : > { %s1430_s5 = sadd.s32 1, %s1295_s18   ;;  %s29_s6 = sadd.s32 1, %s1291_s17 }
  0x3d   : > { %s26_s24 = ssub.s32 %s1295_s18, %s1430_s5  ;;  %p36_p10 = scmp.ne.s32.totalorder %s1291_s17, %s1287_s16 }
  0x3e   : > { %p27_p9 = scmp.eq.s32.totalorder %s26_s24, 0  ;;  %p37_p1 = scmp.eq.s32.totalorder %s1295_s18, 0 }
  0x3f   : > { %p1026_p4 = scmp.lt.s32.totalorder %s1295_s18, 3  ;;  %s1440_s7 = sand.u32 1, %s1291_s17  }
  0x40   : > { %s1443_s8 = scalar_select %p27_p9, %s1291_s17, %s29_s6  }
  0x41   : > { %p38_p5 = por %p37_p1, %p36_p10  ;;  %s878_s9 = sshll.u32 %s1440_s7, 1 }
  0x42   : > { %s879_s10 = sshll.u32 %s1295_s18, 5  ;;  %s183_s13 = scalar_lea.vmem [#allocation3], %s878_s9 }
  0x43   : > { %s1450_s12 = scalar_lea.hbm %s1614_s0, %s879_s10  ;;  %s190_s14 = sshll.u32 %s183_s13, 4  ;;  %s1456_s14 = int_to_ptr.vmem [resolvable:$true] %s190_s14 }
  0x44   : > { %p1452_p8 = pnand %p1026_p4, %p38_p5  ;;  %s880_s22 = sshll.u32 %s1440_s7, 6 }
  0x45   : > { %s180_s25 = scalar_lea.sflag [#allocation4], %s1440_s7  ;;  %s1159_s27 = scalar_lea.hbm %s1450_s12, 32 }
  0x46   : > { %p1160_p6 = scmp.ne.s32.totalorder %s1450_s12, %s1159_s27  ;;  %p1161_p11 = pneg %p1452_p8 }
  0x47   : > { %s1164_s29 = scalar_lea.hbm %s1614_s0, 96  ;;  %p1165_p0 = scmp.lt.u32.totalorder %s1450_s12, %s1614_s0 }
  0x48   : > { %p1162_p12 = pnand %p1161_p11, %p1160_p6  ;;  %p1166_p2 = scmp.lt.u32.totalorder %s1164_s29, %s1159_s27 }
  0x49   : > { %p1168_p7 = scmp.lt.u32.totalorder %s1159_s27, %s1450_s12 }
  0x4a   : > { %p1163_p13 = pneg %p1162_p12  ;;  %p1167_p3 = por %p1166_p2, %p1165_p0 }
  0x4c   : > { %p1169_p10 = por %p1168_p7, %p1167_p3 }
  0x4e   : > { %p1170_p9 = pnand %p1169_p10, %p1163_p13 }
  0x50   : > { %1173 = shalt.err (!%p1170_p9)
}
  0x51   : > { %s1174_s24 = scalar_lea.vmem %s1456_s14, 32  ;;  %s1301_s9 = smov [#allocation3]  }
  0x52   : > { %p1175_p1 = scmp.ne.s32.totalorder %s1456_s14, %s1174_s24  ;;  %s1179_s10 = sshll.u32 %s1301_s9, 4  ;;  %s1180_s10 = int_to_ptr.vmem [resolvable:$false] %s1179_s10 }
  0x53   : > { %s1181_s26 = scalar_lea.vmem %s1180_s10, 64  ;;  %p1182_p6 = scmp.lt.s32.totalorder %s1456_s14, %s1180_s10 }
  0x54   : > { %p1177_p4 = pnand %p1175_p1, %p1161_p11  ;;  %p1183_p12 = scmp.lt.s32.totalorder %s1181_s26, %s1174_s24 }
  0x56   : > { %p1178_p5 = pneg %p1177_p4  ;;  %p1184_p0 = por %p1183_p12, %p1182_p6 }
  0x58   : > { %p1185_p2 = pnand %p1184_p0, %p1178_p5 }
  0x5a   : > { %1188 = shalt.err (!%p1185_p2)
}
  0x5b   : > { %1020 = dma.hbm_to_vmem [thread:$0]  (!%p1452_p8), %s1450_s12, 32, %s1456_s14, %s180_s25  }
  0x5c   : > { %s201_s11 = scalar_lea.vmem [#allocation6], %s880_s22  ;;  %s197_s27 = sand.u32 1, %s1295_s18  }
  0x5d   : > { %s209_s13 = sshll.u32 %s201_s11, 4  ;;  %s925_s28 = sshll.u32 %s1295_s18, 10  ;;  %s1488_s13 = int_to_ptr.vmem [resolvable:$true] %s209_s13 }
  0x5e   : > { %s1494_s30 = scalar_lea.hbm %s1615_s1, %s925_s28  ;;  %s1496_s6 = scalar_lea.sflag [#allocation7], %s197_s27 }
  0x5f   : > { %s1189_s24 = scalar_lea.hbm %s1494_s30, 1024  ;;  %s1194_s18 = scalar_lea.hbm %s1615_s1, 3072 }
  0x60   : > { %p1190_p13 = scmp.ne.s32.totalorder %s1494_s30, %s1189_s24  ;;  %p1195_p10 = scmp.lt.u32.totalorder %s1494_s30, %s1615_s1 }
  0x61   : > { %p1196_p9 = scmp.lt.u32.totalorder %s1194_s18, %s1189_s24  ;;  %p1198_p4 = scmp.lt.u32.totalorder %s1189_s24, %s1494_s30 }
  0x62   : > { %p1192_p3 = pnand %p1190_p13, %p1161_p11 }
  0x63   : > { %p1197_p1 = por %p1196_p9, %p1195_p10 }
  0x64   : > { %p1193_p7 = pneg %p1192_p3 }
  0x65   : > { %p1199_p5 = por %p1198_p4, %p1197_p1 }
  0x67   : > { %p1200_p6 = pnand %p1199_p5, %p1193_p7 }
  0x69   : > { %1203 = shalt.err (!%p1200_p6)
}
  0x6a   : > { %s1204_s25 = scalar_lea.vmem %s1488_s13, 1024  ;;  %s1302_s9 = smov [#allocation6]  }
  0x6b   : > { %p1205_p12 = scmp.ne.s32.totalorder %s1488_s13, %s1204_s25  ;;  %s1209_s10 = sshll.u32 %s1302_s9, 4  ;;  %s1210_s10 = int_to_ptr.vmem [resolvable:$false] %s1209_s10 }
  0x6c   : > { %s1211_s26 = scalar_lea.vmem %s1210_s10, 2048  ;;  %p1212_p13 = scmp.lt.s32.totalorder %s1488_s13, %s1210_s10 }
  0x6d   : > { %p1207_p0 = pnand %p1205_p12, %p1161_p11  ;;  %p1213_p3 = scmp.lt.s32.totalorder %s1211_s26, %s1204_s25 }
  0x6f   : > { %p1208_p2 = pneg %p1207_p0  ;;  %p1214_p10 = por %p1213_p3, %p1212_p13 }
  0x71   : > { %p1215_p9 = pnand %p1214_p10, %p1208_p2 }
  0x73   : > { %1218 = shalt.err (!%p1215_p9)
}
  0x74   : > { %s1303_s11 = smov 256   ;;  %s1304_s27 = smov 16  }
  0x75   : > { %1023 = dma.hbm_to_vmem [thread:$0]  (!%p1452_p8), %s1494_s30, 1024, %s1488_s13, %s1496_s6, %s1303_s11, %s1303_s11, %s1304_s27  }
  0x76   : > { %p1626_p11 = scmp.ne.s32.totalorder %s1623_s21, 0 }
  0x77   : > { %s223_s28 = sand.u32 (!%p1626_p11), 1, %s1287_s16   ;;  %p1627_p7 = scmp.ne.s32.totalorder (!%p1626_p11), %s1622_s20, 0 }
  0x78   : > { %221 = sbr.rel (%p1626_p11) target bundleno = 1101 (0x44d), region = 36  ;;  %s885_s23 = sshll.u32 (!%p1626_p11), %s223_s28, 1 }
  0x79   : > { %s224_s29 = scalar_lea.sflag (!%p1626_p11), [#allocation4], %s223_s28  ;;  %s1525_s24 = scalar_lea.vmem (!%p1626_p11), [#allocation3], %s885_s23 }
  0x7f   : > { %1262 = dma.done.wait (%p1627_p7), %s224_s29, 32  }
  0x80   : > { %1264 = vsyncadd (%p1627_p7), %s224_s29, 4294967264  ;;  %s232_s7 = sand.u32 1, %s1355_s19   ;;  %s886_s15 = sshll.u32 %s223_s28, 6 }
  0x81   : > { %s233_s13 = scalar_lea.sflag [#allocation7], %s232_s7  ;;  %s1532_s30 = scalar_lea.vmem [#allocation6], %s886_s15 }
  0x82   : > { %1266 = dma.done.wait (%p1627_p7), %s233_s13, 1024  }
  0x83   : > { %1268 = vsyncadd (%p1627_p7), %s233_s13, 4294966272  ;;  %p1628_p8 = scmp.eq.s32.totalorder %s1355_s19, 0 }
  0x85   : > { %1270 = dma.done.wait (%p1628_p8), [#allocation7], 3584   ;;  %p1629_p1 = pmov %p1628_p8 }
  0x87   : > { %1272 = vsyncadd (%p1629_p1), [#allocation7], 4294963712  ;;  %p1630_p4 = pmov %p1629_p1 }
  0x88   : > { %p1631_p5 = pmov %p1629_p1 }
  0x89   : > { %1274 = dma.done.wait (%p1630_p4), [#allocation10], 256  }
  0x8a   : > { %1276 = vsyncadd (%p1631_p5), [#allocation10], 4294967040  ;;  %p1632_p6 = scmp.ne.s32.totalorder %s1355_s19, 0 }
  0x8b   : > { %v1305_v0 = vmov (!%p1632_p6), 0.0  }
  0x8c   : > { %274 = sbr.rel (%p1632_p6) target bundleno = 147 (0x93), region = 56  ;;  %275 = vst [vmem:[#allocation2] sm:$0xf] (!%p1632_p6), %v1305_v0 }
  0x93 PF: > { %v279_v1 = vld [vmem:[%s1532_s30 + $0x8] sm:$0xff]  ;;  %v278_v2 = vld [vmem:[%s1532_s30] sm:$0xff]  ;;  %v1306_v6 = vmov 0   ;;  %v281_v7 = vld [vmem:[%s1532_s30 + $0x18] sm:$0xff]  ;;  %v1307_v28 = vmov 1983009808   ;;  %v350_v30 = vlaneseq }
  0x94   : > { %v287_v3 = vunpack.c.l.s8.bf16 %v279_v1  ;;  %v289_v4 = vunpack.c.h.s8.bf16 %v279_v1  ;;  %v286_v5 = vunpack.c.l.s8.bf16 %v278_v2  ;;  %335 = vmatprep.mubr.bf16.mxu0 %v1306_v6  ;;  %v288_v8 = vunpack.c.h.s8.bf16 %v278_v2  ;;  %v280_v10 = vld [vmem:[%s1532_s30 + $0x10] sm:$0xff]  ;;  %v283_v13 = vld [vmem:[%s1532_s30 + $0x28] sm:$0xff]  ;;  %v282_v16 = vld [vmem:[%s1532_s30 + $0x20] sm:$0xff]  ;;  %p890_p12 = scmp.ne.s32.totalorder %s1355_s19, 2 }
  0x95   : > { %v291_v9 = vunpack.c.l.s8.bf16 %v281_v7  ;;  %v290_v11 = vunpack.c.l.s8.bf16 %v280_v10  ;;  %v293_v12 = vunpack.c.h.s8.bf16 %v281_v7  ;;  %v292_v14 = vunpack.c.h.s8.bf16 %v280_v10  ;;  %v285_v19 = vld [vmem:[%s1532_s30 + $0x38] sm:$0xff]  ;;  %v284_v22 = vld [vmem:[%s1532_s30 + $0x30] sm:$0xff]  ;;  %v1075_v42 = vld [vmem:[#allocation8 + $0x40] sm:$0xff] (!%p890_p12)  }
  0x96   : > { %303 = vmatprep.subr.bf16.mxu0 %v287_v3  ;;  %v295_v15 = vunpack.c.l.s8.bf16 %v283_v13  ;;  %v294_v17 = vunpack.c.l.s8.bf16 %v282_v16  ;;  %v297_v18 = vunpack.c.h.s8.bf16 %v283_v13  ;;  %v296_v20 = vunpack.c.h.s8.bf16 %v282_v16  ;;  %v276_v26 = vld [vmem:[%s1525_s24] sm:$0x3]  ;;  %v302_v38 = vld [vmem:[#allocation2] sm:$0xf]  ;;  %v1076_v43 = vld [vmem:[#allocation8] sm:$0xff] (!%p890_p12)  }
  0x97   : > { %304 = vmatpush1.bf16.msra.mxu0 %v286_v5  ;;  %v299_v21 = vunpack.c.l.s8.bf16 %v285_v19  ;;  %v298_v23 = vunpack.c.l.s8.bf16 %v284_v22  ;;  %v301_v24 = vunpack.c.h.s8.bf16 %v285_v19  ;;  %v300_v25 = vunpack.c.h.s8.bf16 %v284_v22  ;;  %v1077_v44 = vld [vmem:[#allocation8 + $0x48] sm:$0xff] (!%p890_p12)   ;;  %v1079_v47 = vld [vmem:[#allocation8 + $0x50] sm:$0xff] (!%p890_p12)   ;;  %v1081_v49 = vld [vmem:[#allocation8 + $0x58] sm:$0xff] (!%p890_p12)  }
  0x98   : > { %305 = vmatprep.subr.bf16.mxu0 %v289_v4  ;;  %v277_v27 = vpack.c.bf16 %v276_v26, %v276_v26  ;;  %v348_v29 = vunpack.c.l.s4 %v1307_v28  ;;  %v351_v32 = vshrl.u32 %v350_v30, 7  ;;  %v1078_v45 = vld [vmem:[#allocation8 + $0x8] sm:$0xff] (!%p890_p12)   ;;  %v1308_v46 = vmov (!%p890_p12), 0.0   ;;  %v1080_v48 = vld [vmem:[#allocation8 + $0x10] sm:$0xff] (!%p890_p12)   ;;  %v1082_v50 = vld [vmem:[#allocation8 + $0x18] sm:$0xff] (!%p890_p12)  }
  0x99   : > { %962 = vmatprep.subr.bf16.mxu1 (!%p890_p12), %v1308_v46  ;;  %v1083_v51 = vld [vmem:[#allocation8 + $0x60] sm:$0xff] (!%p890_p12)   ;;  %v1085_v55 = vld [vmem:[#allocation8 + $0x68] sm:$0xff] (!%p890_p12)   ;;  %v1087_v63 = vld [vmem:[#allocation8 + $0x70] sm:$0xff] (!%p890_p12)   ;;  %vm1309_vm0 = vmmov (!%p890_p12), 0   ;;  %vm728_vm1 = vcmask (!%p890_p12), 523264   ;;  %vm772_vm2 = vcmask (!%p890_p12), 17408  }
  0x9a   : > { %v349_v31 = vunpack.c.0.s8 %v348_v29  ;;  %v368_v52 = vsub.s32 (!%p890_p12), 0, %v351_v32  ;;  %v372_v53 = vsub.s32 (!%p890_p12), 1, %v351_v32  ;;  %v1084_v54 = vld [vmem:[#allocation8 + $0x20] sm:$0xff] (!%p890_p12)   ;;  %v1086_v58 = vld [vmem:[#allocation8 + $0x28] sm:$0xff] (!%p890_p12)   ;;  %v1088_v5 = vld [vmem:[#allocation8 + $0x30] sm:$0xff] (!%p890_p12)   ;;  %978 = vmatprep.mubr.msk.bf16.mxu1 (!%p890_p12), %vm1309_vm0, %v1308_v46 }
  0x9b   : > { %306 = vmatpush1.bf16.msra.mxu0 %v288_v8  ;;  %v361_v56 = vld [vmem:[#allocation9] ss:$8 sm:$0x3] (!%p890_p12)  ;;  %v363_v57 = vld [vmem:[#allocation9 + $0x1] ss:$8 sm:$0x3] (!%p890_p12) }
  0x9c   : > { %307 = vmatprep.subr.bf16.mxu0 %v291_v9  ;;  %v1557_v34 = vsub.s32 %v349_v31, %v351_v32  ;;  %v369_v59 = vrot.slane (!%p890_p12), %v361_v56, %v368_v52  ;;  %v373_v60 = vrot.slane (!%p890_p12), %v361_v56, %v372_v53  ;;  %v388_v61 = vrot.slane (!%p890_p12), %v363_v57, %v368_v52  ;;  %v1091_v0 = vld [vmem:[#allocation8 + $0x80] sm:$0xff] (!%p890_p12)   ;;  %v1092_v4 = vld [vmem:[#allocation8 + $0x88] sm:$0xff] (!%p890_p12)   ;;  %v1089_v8 = vld [vmem:[#allocation8 + $0x78] sm:$0xff] (!%p890_p12)  }
  0x9d   : > { %v392_v62 = vrot.slane (!%p890_p12), %v363_v57, %v372_v53  ;;  %963 = vmatpush3.bf16.msra.mxu1 (!%p890_p12), %v1091_v0  ;;  %v1093_v10 = vld [vmem:[#allocation8 + $0x90] sm:$0xff] (!%p890_p12)   ;;  %v1098_v22 = vld [vmem:[#allocation8 + $0xb8] sm:$0xff] (!%p890_p12)   ;;  %v436_v26 = vld [vmem:[#allocation9 + $0x2] ss:$0 sm:$0xff] (!%p890_p12) }
  0x9e   : > { %v374_v2 = vcombine.low (!%p890_p12), %v369_v59, %v373_v60  ;;  %964 = vmatprep.subr.bf16.mxu1 (!%p890_p12), %v1308_v46 }
  0x9f   : > { %308 = vmatpush1.bf16.msra.mxu0 %v290_v11  ;;  %v393_v3 = vcombine.low (!%p890_p12), %v388_v61, %v392_v62 }
  0xa0   : > { %309 = vmatprep.subr.bf16.mxu0 %v293_v12  ;;  %v381_v6 = vrot.slane (!%p890_p12), %v374_v2, %v1557_v34  ;;  %v1090_v12 = vld [vmem:[#allocation8 + $0x38] sm:$0xff] (!%p890_p12)  }
  0xa1   : > { %v400_v7 = vrot.slane (!%p890_p12), %v393_v3, %v1557_v34  ;;  %965 = vmatpush3.bf16.msra.mxu1 (!%p890_p12), %v1092_v4 }
  0xa2   : > { %966 = vmatprep.subr.bf16.mxu1 (!%p890_p12), %v1308_v46 }
  0xa3   : > { %310 = vmatpush1.bf16.msra.mxu0 %v292_v14  ;;  %v1094_v14 = vld [vmem:[#allocation8 + $0x98] sm:$0xff] (!%p890_p12)  }
  0xa4   : > { %311 = vmatprep.subr.bf16.mxu0 %v295_v15 }
  0xa5   : > { %967 = vmatpush3.bf16.msra.mxu1 (!%p890_p12), %v1093_v10 }
  0xa6   : > { %968 = vmatprep.subr.bf16.mxu1 (!%p890_p12), %v1308_v46 }
  0xa7   : > { %312 = vmatpush1.bf16.msra.mxu0 %v294_v17 }
  0xa8   : > { %313 = vmatprep.subr.bf16.mxu0 %v297_v18  ;;  %v1095_v18 = vld [vmem:[#allocation8 + $0xa0] sm:$0xff] (!%p890_p12)  }
  0xa9   : > { %969 = vmatpush3.bf16.msra.mxu1 (!%p890_p12), %v1094_v14 }
  0xaa   : > { %970 = vmatprep.subr.bf16.mxu1 (!%p890_p12), %v1308_v46 }
  0xab   : > { %314 = vmatpush1.bf16.msra.mxu0 %v296_v20  ;;  %v1096_v20 = vld [vmem:[#allocation8 + $0xa8] sm:$0xff] (!%p890_p12)  }
  0xac   : > { %315 = vmatprep.subr.bf16.mxu0 %v299_v21  ;;  %v1097_v21 = vld [vmem:[#allocation8 + $0xb0] sm:$0xff] (!%p890_p12)  }
  0xad   : > { %971 = vmatpush3.bf16.msra.mxu1 (!%p890_p12), %v1095_v18 }
  0xae   : > { %972 = vmatprep.subr.bf16.mxu1 (!%p890_p12), %v1308_v46 }
  0xaf   : > { %316 = vmatpush1.bf16.msra.mxu0 %v298_v23  ;;  %v1099_v23 = vld [vmem:[#allocation8 + $0xc0] sm:$0xff] (!%p890_p12)  }
  0xb0   : > { %317 = vmatprep.subr.bf16.mxu0 %v301_v24  ;;  %v1100_v24 = vld [vmem:[#allocation8 + $0xc8] sm:$0xff] (!%p890_p12)  }
  0xb1   : > { %973 = vmatpush3.bf16.msra.mxu1 (!%p890_p12), %v1096_v20 }
  0xb2   : > { %974 = vmatprep.subr.bf16.mxu1 (!%p890_p12), %v1308_v46 }
  0xb3   : > { %318 = vmatpush1.bf16.msra.mxu0 %v300_v25 }
  0xb4   : > { %926 = vmatprep.subr.bf16.mxu0 (!%p890_p12), %v1075_v42 }
  0xb5   : > { %975 = vmatpush3.bf16.msra.mxu1 (!%p890_p12), %v1097_v21 }
  0xb6   : > { %336 = vmatmul.mubr.bf16.vlgmr.msra.gmra.mrb[0].mxu0 %v277_v27  ;;  %976 = vmatprep.subr.bf16.mxu1 (!%p890_p12), %v1308_v46 }
  0xb7   : > { %927 = vmatpush3.bf16.msra.mxu0 (!%p890_p12), %v1076_v43 }
  0xb8   : > { %928 = vmatprep.subr.bf16.mxu0 (!%p890_p12), %v1077_v44  ;;  %v702_v44 = vld [vmem:[#allocation9 + $0x4] ss:$0 sm:$0xff] (!%p890_p12) }
  0xb9   : > { %977 = vmatpush3.bf16.msra.mxu1 (!%p890_p12), %v1098_v22 }
  0xbb   : > { %929 = vmatpush3.bf16.msra.mxu0 (!%p890_p12), %v1078_v45 }
  0xbc   : > { %930 = vmatprep.subr.bf16.mxu0 (!%p890_p12), %v1079_v47 }
  0xbf   : > { %931 = vmatpush3.bf16.msra.mxu0 (!%p890_p12), %v1080_v48 }
  0xc0   : > { %932 = vmatprep.subr.bf16.mxu0 (!%p890_p12), %v1081_v49 }
  0xc3   : > { %933 = vmatpush3.bf16.msra.mxu0 (!%p890_p12), %v1082_v50 }
  0xc4   : > { %934 = vmatprep.subr.bf16.mxu0 (!%p890_p12), %v1083_v51 }
  0xc7   : > { %935 = vmatpush3.bf16.msra.mxu0 (!%p890_p12), %v1084_v54 }
  0xc8   : > { %936 = vmatprep.subr.bf16.mxu0 (!%p890_p12), %v1085_v55 }
  0xcb   : > { %937 = vmatpush3.bf16.msra.mxu0 (!%p890_p12), %v1086_v58 }
  0xcc   : > { %938 = vmatprep.subr.bf16.mxu0 (!%p890_p12), %v1087_v63 }
  0xcf   : > { %939 = vmatpush3.bf16.msra.mxu0 (!%p890_p12), %v1088_v5 }
  0xd0   : > { %940 = vmatprep.subr.bf16.mxu0 (!%p890_p12), %v1089_v8 }
  0xd3   : > { %941 = vmatpush3.bf16.msra.mxu0 (!%p890_p12), %v1090_v12 }
  0xd4   : > { %982 = vmatprep.subr.bf16.mxu0 (!%p890_p12), %v1308_v46 }
 0x189   : > { %v337_v33 = vpop.f32.mrb[0].mxu0 }
 0x18a   : > { %v339_v35 = vpop.f32.mrb[1].mxu0 }
 0x18b   : > { %v346_v36 = vcombine.low %v337_v33, %v339_v35  ;;  %v341_v37 = vpop.f32.mrb[2].mxu0  ;;  %360 = sbr.rel (%p890_p12) target bundleno = 1076 (0x434), region = 60  ;;  %v1102_v35 = vld [vmem:[#allocation8 + $0xd8] sm:$0xff] (!%p890_p12)  }
 0x18c   : > { %v342_v39 = vpop.f32.mrb[3].mxu0 }
 0x18d   : > { %v353_v40 = vrot.slane %v346_v36, %v1557_v34  ;;  %v603_v36 = vld [vmem:[#allocation9 + $0x3] ss:$0 sm:$0xff] (!%p890_p12) }
 0x18f   : > { %v355_v41 = vadd.f32 %v353_v40, %v302_v38 }
 0x191   : > { %356 = vst [vmem:[#allocation2] sm:$0xf] %v355_v41 }
 0x198   : > { %v364_v1 = vld [vmem:[#allocation2] sm:$0xf] }
 0x199   : > { %v383_v9 = vmul.f32 %v381_v6, %v364_v1 }
 0x19b   : > { %v402_v11 = vadd.f32 %v400_v7, %v383_v9 }
 0x19d   : > { %v403_v13 = vmax.f32 %v402_v11, 0.0 }
 0x19f   : > { %v444_v15 = vrot.slane %v403_v13, %v1557_v34  ;;  %v1101_v34 = vld [vmem:[#allocation8 + $0xd0] sm:$0xff]  }
 0x1a1   : > { %v445_v16 = vcombine.high %v444_v15, %v444_v15  ;;  %v448_v17 = vpack.c.bf16 %v444_v15, %v444_v15 }
 0x1a3   : > { %v449_v19 = vpack.c.bf16 %v445_v16, %v445_v16 }
 0x1a5   : > { %578 = vmatprep.mubr.bf16.mxu0 %v449_v19 }
 0x1a6   : > { %579 = vmatmul.mubr.bf16.vlgmr.msra.gmra.mrb[0].mxu0 %v448_v17 }
 0x1a7   : > { %990 = vmatprep.mubr.msk.bf16.mxu0 %vm1309_vm0, %v1308_v46  ;;  %983 = vmatpush3.bf16.msra.mxu0 %v1099_v23 }
 0x1a8   : > { %984 = vmatprep.subr.bf16.mxu0 %v1308_v46 }
 0x1ab   : > { %985 = vmatpush3.bf16.msra.mxu0 %v1100_v24 }
 0x1ac   : > { %986 = vmatprep.subr.bf16.mxu0 %v1308_v46 }
 0x1af   : > { %987 = vmatpush3.bf16.msra.mxu0 %v1101_v34 }
 0x1b0   : > { %988 = vmatprep.subr.bf16.mxu0 %v1308_v46 }
 0x1b3   : > { %989 = vmatpush3.bf16.msra.mxu0 %v1102_v35 }
 0x279   : > { %v942_v25 = vpop.f32.mrb[0].mxu0 }
 0x27a   : > { %v943_v27 = vpop.f32.mrb[1].mxu0 }
 0x27b   : > { %v944_v28 = vadd.f32 %v943_v27, %v942_v25  ;;  %v945_v29 = vpop.f32.mrb[2].mxu0 }
 0x27c   : > { %v946_v30 = vpop.f32.mrb[3].mxu0 }
 0x27d   : > { %v581_v31 = vadd.f32 %v944_v28, %v436_v26 }
 0x27f   : > { %v586_v32 = vmax.f32 %v581_v31, 0.0 }
 0x281   : > { %v604_v33 = vpack.c.bf16 %v586_v32, %v586_v32 }
 0x283   : > { %979 = vmatmul.mubr.bf16.vlgmr.msra.gmra.mrb[0].mxu1 %v604_v33 }
 0x356   : > { %v687_v37 = vpop.f32.mrb[0].mxu1 }
 0x357   : > { %v688_v38 = vadd.f32 %v687_v37, %v603_v36  ;;  %v980_v39 = vpop.f32.mrb[1].mxu1 }
 0x358   : > { %v690_v40 = vpop.f32.mrb[2].mxu1 }
 0x359   : > { %v693_v41 = vmax.f32 %v688_v38, 0.0  ;;  %v981_v42 = vpop.f32.mrb[3].mxu1 }
 0x35b   : > { %v703_v43 = vpack.c.bf16 %v693_v41, %v693_v41 }
 0x35d   : > { %991 = vmatmul.mubr.msk.bf16.vlgmr.msra.gmra.mrb[4].mxu0 %vm728_vm1, %v703_v43 }
 0x430   : > { %v766_v45 = vpop.f32.mrb[4].mxu0 }
 0x431   : > { %v767_v47 = vadd.f32 %v766_v45, %v702_v44  ;;  %v992_v48 = vpop.f32.mrb[5].mxu0 }
 0x432   : > { %v769_v49 = vpop.f32.mrb[6].mxu0 }
 0x433   : > { %773 = vst.msk [vmem:[#allocation11] sm:$0x3] %vm772_vm2, %v767_v47  ;;  %v993_v46 = vpop.f32.mrb[7].mxu0 }
 0x434 PF: > { %p1029_p0 = scmp.eq.s32.totalorder %s1355_s19, 2  ;;  %s1310_s20 = smov [#allocation11]  }
 0x435   : > { %s781_s21 = sshll.u32 %s1310_s20, 4  ;;  %s782_s21 = int_to_ptr.vmem [resolvable:$true] %s781_s21 }
 0x436   : > { %s1219_s6 = scalar_lea.vmem %s782_s21, 32  ;;  %p1226_p10 = scmp.lt.s32.totalorder %s782_s21, %s782_s21 }
 0x437   : > { %p1220_p2 = scmp.ne.s32.totalorder %s782_s21, %s1219_s6  ;;  %p1227_p9 = scmp.lt.s32.totalorder %s1219_s6, %s1219_s6 }
 0x439   : > { %p1221_p13 = pnand %p1220_p2, %p1029_p0  ;;  %p1228_p11 = por %p1227_p9, %p1226_p10 }
 0x43b   : > { %p1222_p3 = pneg %p1221_p13 }
 0x43d   : > { %p1229_p7 = pnand %p1228_p11, %p1222_p3 }
 0x43f   : > { %1232 = shalt.err (!%p1229_p7)
}
 0x440   : > { %s1233_s14 = scalar_lea.hbm %s1618_s4, 32 }
 0x441   : > { %p1234_p8 = scmp.ne.s32.totalorder %s1618_s4, %s1233_s14  ;;  %p1239_p5 = scmp.lt.u32.totalorder %s1233_s14, %s1618_s4 }
 0x443   : > { %p1235_p1 = pnand %p1234_p8, %p1029_p0 }
 0x445   : > { %p1236_p4 = pneg %p1235_p1 }
 0x447   : > { %p1241_p6 = pnand %p1239_p5, %p1236_p4 }
 0x449   : > { %1244 = shalt.err (!%p1241_p6)
}
 0x44a   : > { %1007 = dma.vmem_to_hbm [thread:$0]  (%p1029_p0), %s782_s21, 32, %s1618_s4, [#allocation5]  }
 0x44b   : > { %1278 = dma.done.wait (%p1029_p0), [#allocation5], 32  }
 0x44c   : > { %1280 = vsyncadd (%p1029_p0), [#allocation5], 4294967264 }
 0x44d PF: > { %p19_p12 = scmp.ge.s32.totalorder %s1430_s5, 5   ;;  %s1633_s15 = smov %s1287_s16 }
 0x44e   : > { %s1634_s16 = smov %s1291_s17  ;;  %s1635_s17 = smov %s1443_s8 }
 0x44f   : > { %s1636_s18 = smov %s1430_s5  ;;  %21 = sbr.rel (!%p19_p12) target bundleno = 7 (0x7), region = 103 }
 0x456   :  { %794 = vsyncpa [#allocation4], 1 }
 0x457   :  { %796 = vsyncpa [#allocation4 + $0x1], 1 }
 0x458   :  { %797 = vsyncpa [#allocation7], 1 }
 0x459   :  { %799 = vsyncpa [#allocation7 + $0x1], 1 }
 0x45a   :  { %800 = vsyncpa [#allocation10], 1 }
 0x45b   :  { %801 = vsyncpa [#allocation5], 1 }
 0x45c   :  { %803 = vsyncpa [#allocation5 + $0x1], 1 }

</bundles_post_ra>
